<compile_context>
chip_gen: v6e
topology: v6e:2x2x1
jax: 0.10.0
libtpu: 0.0.40
codegen_flags: <defaults>
</compile_context>

<pallas_src>
import functools

import jax
import jax.numpy as jnp
from jax.experimental import pallas as pl
from jax.experimental.pallas import tpu as pltpu


MX_DTYPE = jnp.bfloat16   # MXU input dtype (accumulation is always f32).


# ----------------------------------------------------------------------------
# Hoisted x-side projection: one big matmul over all (T, B, N) rows.
# ----------------------------------------------------------------------------
def _proj_kernel(x_ref, w_ref, o_ref):
    o_ref[...] = jnp.dot(x_ref[...], w_ref[...],
                         preferred_element_type=jnp.float32).astype(o_ref.dtype)


def _project_inputs(x_flat, w):
    M, K = x_flat.shape
    P = w.shape[1]
    return pl.pallas_call(
        _proj_kernel,
        out_shape=jax.ShapeDtypeStruct((M, P), MX_DTYPE),
        grid=(1,),
        in_specs=[pl.BlockSpec((M, K), lambda i: (0, 0)),
                  pl.BlockSpec((K, P), lambda i: (0, 0))],
        out_specs=pl.BlockSpec((M, P), lambda i: (0, 0)),
    )(x_flat, w)


# ----------------------------------------------------------------------------
# Fused sequence kernel: one (batch, timestep) grid step per invocation.
# Hidden state is carried across the T axis in VMEM scratch.
# ----------------------------------------------------------------------------
def agrnn_seq_kernel(xw_ref, h0_ref, wh1_ref, wch_ref, bg_ref, bc_ref,
                     o_ref, h_scr, *, nhead, ncl, dout, top_k):
    t = pl.program_id(1)
    HC = nhead * ncl

    @pl.when(t == 0)
    def _():
        h_scr[...] = h0_ref[...]

    h = h_scr[...]                                              # [N, dout] f32

    # h-side projections (cluster logits + GRU gate inputs) in one bf16 matmul.
    wh1 = wh1_ref[...]
    ph = jnp.dot(h.astype(wh1.dtype), wh1,
                 preferred_element_type=jnp.float32)            # [N, HC + 2*dout]

    xw = xw_ref[...].astype(jnp.float32)                        # [N, HC + 3*dout]
    logits_all = xw[:, :HC] + ph[:, :HC]                        # x@wclx + h@wclh (all heads)
    gx = xw[:, HC:HC + 2 * dout] + ph[:, HC:]                   # x@wgx + h@wgh
    cx = xw[:, HC + 2 * dout:]                                  # x@wcx

    # --- per-head soft cluster assignment -> top_k sparsify -> normalized S ---
    S_list = []
    for head in range(nhead):
        lg = logits_all[:, head * ncl:(head + 1) * ncl]         # [N, C]
        m = jnp.max(lg, axis=-1, keepdims=True)
        e = jnp.exp(lg - m)
        S = e * pl.reciprocal(jnp.sum(e, axis=-1, keepdims=True), approx=True)

        # top_k sparsification over clusters (same scheme as the reference kernel).
        cur = S
        thresh = jnp.full_like(S[:, :1], -jnp.inf)
        for _ in range(top_k):
            thresh = jnp.max(cur, axis=-1, keepdims=True)
            cur = jnp.where(cur >= thresh, -jnp.inf, cur)
        S_sp = jnp.where(S >= thresh, S, 0.0)
        S_sp = S_sp * pl.reciprocal(jnp.sum(S_sp, axis=-1, keepdims=True), approx=True)
        S_list.append(S_sp)

    inv_h = jnp.float32(1.0 / nhead)

    def apply_A(v):
        # mean_h A_h @ v with A_h = S_h S_h^T, without materializing the N x N adjacency.
        acc = None
        for S_sp in S_list:
            sv = jax.lax.dot_general(S_sp, v, (((0,), (0,)), ((), ())),
                                     preferred_element_type=jnp.float32)   # [C, d]
            av = jnp.dot(S_sp, sv, preferred_element_type=jnp.float32)     # [N, d]
            acc = av if acc is None else acc + av
        return acc * inv_h

    # --- GRU gates -----------------------------------------------------------
    zr = jax.nn.sigmoid(apply_A(gx) + bg_ref[...])              # [N, 2*dout]
    z = zr[:, :dout]
    r = zr[:, dout:]

    wch = wch_ref[...]
    pzh = jnp.dot((z * h).astype(wch.dtype), wch,
                  preferred_element_type=jnp.float32)           # (z*h)@wch
    hc = jnp.tanh(apply_A(cx + pzh) + bc_ref[...])              # [N, dout]

    h_new = r * h + (1.0 - r) * hc
    h_scr[...] = h_new
    # TODO(synk): packing several timesteps per store (lane-dense output block) would
    #             avoid masked stores on the 32-wide last dim; skipped to stay reshape-free.
    o_ref[...] = h_new


# ----------------------------------------------------------------------------
# One AGRNN layer: hoisted projection + fused recurrence over the sequence.
# ----------------------------------------------------------------------------
def agrnn_layer_seq(x_seq, h0, params, *, top_k):
    T, B, N, din = x_seq.shape
    dout = h0.shape[-1]
    nhead, _, ncl = params["wclx"].shape
    HC = nhead * ncl
    P = HC + 3 * dout

    # Pack x-side weights: [din, HC | 2*dout | dout]   (head-major cluster columns).
    wx_all = jnp.concatenate(
        [params["wclx"].transpose(1, 0, 2).reshape(din, HC),
         params["wgx"], params["wcx"]], axis=1).astype(MX_DTYPE)
    # Pack h-side weights: [dout, HC | 2*dout].
    wh1 = jnp.concatenate(
        [params["wclh"].transpose(1, 0, 2).reshape(dout, HC),
         params["wgh"]], axis=1).astype(MX_DTYPE)
    wch = params["wch"].astype(MX_DTYPE)
    bg = params["bg"].astype(jnp.float32)
    bc = params["bc"].astype(jnp.float32)

    # Hoisted projection of every timestep's input in one matmul.
    xw = _project_inputs(x_seq.reshape(T * B * N, din).astype(MX_DTYPE), wx_all)
    xw = xw.reshape(T, B, N, P)

    kernel = functools.partial(agrnn_seq_kernel, nhead=nhead, ncl=ncl,
                               dout=dout, top_k=top_k)

    h_seq = pl.pallas_call(
        kernel,
        out_shape=jax.ShapeDtypeStruct((B, T, N, dout), jnp.float32),
        grid=(B, T),
        in_specs=[
            pl.BlockSpec((None, None, N, P), lambda b, t: (t, b, 0, 0)),   # xw  [T,B,N,P]
            pl.BlockSpec((None, N, dout), lambda b, t: (b, 0, 0)),         # h0  [B,N,dout]
            pl.BlockSpec((dout, HC + 2 * dout), lambda b, t: (0, 0)),      # wh1
            pl.BlockSpec((dout, dout), lambda b, t: (0, 0)),               # wch
            pl.BlockSpec((1, 2 * dout), lambda b, t: (0, 0)),              # bg
            pl.BlockSpec((1, dout), lambda b, t: (0, 0)),                  # bc
        ],
        out_specs=pl.BlockSpec((None, None, N, dout), lambda b, t: (b, t, 0, 0)),
        scratch_shapes=[pltpu.VMEM((N, dout), jnp.float32)],               # carried hidden
        compiler_params=pltpu.CompilerParams(
            dimension_semantics=("parallel", "arbitrary")),
    )(xw, h0, wh1, wch, bg, bc)

    h_last = h_seq[:, -1]
    return h_seq, h_last


# ----------------------------------------------------------------------------
# AGRNN forward: mirrors the PyTorch module's forward.
# ----------------------------------------------------------------------------
def agrnn_forward(x, init_state, params_list, *, top_k):
    current_inputs = x
    output_hidden = []
    for i, p in enumerate(params_list):
        # Dim 0 of current_inputs is the sequence axis, dim 1 the batch axis, matching
        # the PyTorch source's literal `current_inputs[t, :, :, :]` indexing.
        h_seq, h_last = agrnn_layer_seq(current_inputs, init_state[i], p, top_k=top_k)
        output_hidden.append(h_last)
        current_inputs = h_seq   # == torch.stack(inner_states, dim=1) -> [B, T, N, dout]
    return current_inputs, output_hidden


def init_hidden(num_layers, batch_size, num_node, dim_out):
    return jnp.zeros((num_layers, batch_size, num_node, dim_out), jnp.float32)


def make_cell_params(key, nhead, din, dout, num_clusters):
    ks = jax.random.split(key, 8)
    s = 0.1
    return {
        "wclx": s * jax.random.normal(ks[0], (nhead, din, num_clusters), jnp.float32),
        "wclh": s * jax.random.normal(ks[1], (nhead, dout, num_clusters), jnp.float32),
        "wgx":  s * jax.random.normal(ks[2], (din, 2 * dout), jnp.float32),
        "wgh":  s * jax.random.normal(ks[3], (dout, 2 * dout), jnp.float32),
        "bg":   s * jax.random.normal(ks[4], (1, 2 * dout), jnp.float32),
        "wcx":  s * jax.random.normal(ks[5], (din, dout), jnp.float32),
        "wch":  s * jax.random.normal(ks[6], (dout, dout), jnp.float32),
        "bc":   s * jax.random.normal(ks[7], (1, dout), jnp.float32),
    }


if __name__ == "__main__":
    # Hyperparameters (small, consistent with the module's forward).
    nhead, dim_in, dim_out = 2, 4, 32
    num_clusters, top_k, num_layers = 4, 2, 1
    T, B, N = 8, 2, 16   # seq length, batch, num nodes

    key = jax.random.PRNGKey(0)
    k_x, k_p = jax.random.split(key)

    # Deterministic parameters for each layer.
    pkeys = jax.random.split(k_p, num_layers)
    params_list = []
    for i in range(num_layers):
        din_i = dim_in if i == 0 else dim_out
        params_list.append(make_cell_params(pkeys[i], nhead, din_i, dim_out, num_clusters))

    # Inputs: x [T, B, N, dim_in], init hidden [num_layers, B, N, dim_out].
    x = jax.random.normal(k_x, (T, B, N, dim_in), jnp.float32)
    h0 = init_hidden(num_layers, B, N, dim_out)

    fwd = jax.jit(functools.partial(agrnn_forward, top_k=top_k))
    current_inputs, output_hidden = fwd(x, h0, params_list)
    current_inputs = jax.block_until_ready(current_inputs)
    output_hidden = [jax.block_until_ready(h) for h in output_hidden]

    assert current_inputs.shape == (B, T, N, dim_out)
    assert output_hidden[-1].shape == (B, N, dim_out)
    assert bool(jnp.all(jnp.isfinite(current_inputs)))
    print("KERNEL_OK")
</pallas_src>

<mosaic_0001>
module attributes {stable_mosaic.version = 11 : i64} {
  func.func @_proj_kernel(%arg0: i32, %arg1: memref<256x4xbf16, #tpu.memory_space<vmem>>, %arg2: memref<4x104xbf16, #tpu.memory_space<vmem>>, %arg3: memref<256x104xbf16, #tpu.memory_space<vmem>>) attributes {dimension_semantics = [#tpu.dimension_semantics<arbitrary>], iteration_bounds = array<i64: 1>, scalar_prefetch = 0 : i64, scratch_operands = 0 : i64, tpu.core_type = #tpu.core_type<tc>, window_params = [{pipeline_mode = #tpu.pipeline_mode<synchronous>, transform_indices = @transform_0, window_bounds = array<i64: 256, 4>}, {pipeline_mode = #tpu.pipeline_mode<synchronous>, transform_indices = @transform_1, window_bounds = array<i64: 4, 104>}, {pipeline_mode = #tpu.pipeline_mode<synchronous>, transform_indices = @transform_2, window_bounds = array<i64: 256, 104>}]} {
    %c0 = arith.constant 0 : index
    %c0_0 = arith.constant 0 : index
    %0 = vector.load %arg1[%c0, %c0_0] : memref<256x4xbf16, #tpu.memory_space<vmem>>, vector<256x4xbf16>
    %c0_1 = arith.constant 0 : index
    %c0_2 = arith.constant 0 : index
    %1 = vector.load %arg2[%c0_1, %c0_2] : memref<4x104xbf16, #tpu.memory_space<vmem>>, vector<4x104xbf16>
    %cst = arith.constant dense<0.000000e+00> : vector<256x104xf32>
    %2 = tpu.matmul %0, %1, %cst {dimension_numbers = #tpu.dot_dimension_numbers<[1], [0], [0], [1], [0, 0, 1, 1], [], []>} : vector<256x4xbf16>, vector<4x104xbf16>, vector<256x104xf32> -> vector<256x104xf32>
    %3 = arith.truncf %2 : vector<256x104xf32> to vector<256x104xbf16>
    %c0_3 = arith.constant 0 : index
    %c0_4 = arith.constant 0 : index
    %4 = vector.load %arg3[%c0_3, %c0_4] : memref<256x104xbf16, #tpu.memory_space<vmem>>, vector<256x104xbf16>
    tpu.vector_store %arg3[%c0_3, %c0_4], %3 {strides = array<i32>} : memref<256x104xbf16, #tpu.memory_space<vmem>>, vector<256x104xbf16>,
    return
  }
  func.func @transform_0(%arg0: i32) -> (i32, i32) {
    %c0_i32 = arith.constant 0 : i32
    %c0_i32_0 = arith.constant 0 : i32
    %c0_i32_1 = arith.constant 0 : i32
    return %c0_i32, %c0_i32_0 : i32, i32
  }
  func.func @transform_1(%arg0: i32) -> (i32, i32) {
    %c0_i32 = arith.constant 0 : i32
    %c0_i32_0 = arith.constant 0 : i32
    %c0_i32_1 = arith.constant 0 : i32
    return %c0_i32, %c0_i32_0 : i32, i32
  }
  func.func @transform_2(%arg0: i32) -> (i32, i32) {
    %c0_i32 = arith.constant 0 : i32
    %c0_i32_0 = arith.constant 0 : i32
    %c0_i32_1 = arith.constant 0 : i32
    return %c0_i32, %c0_i32_0 : i32, i32
  }
}

module attributes {stable_mosaic.version = 11 : i64} {
  func.func @agrnn_seq_kernel(%arg0: i32, %arg1: i32, %arg2: memref<1x1x16x104xbf16, #tpu.memory_space<vmem>>, %arg3: memref<1x16x32xf32, #tpu.memory_space<vmem>>, %arg4: memref<32x72xbf16, #tpu.memory_space<vmem>>, %arg5: memref<32x32xbf16, #tpu.memory_space<vmem>>, %arg6: memref<1x64xf32, #tpu.memory_space<vmem>>, %arg7: memref<1x32xf32, #tpu.memory_space<vmem>>, %arg8: memref<1x1x16x32xf32, #tpu.memory_space<vmem>>, %arg9: memref<16x32xf32, #tpu.memory_space<vmem>>) attributes {dimension_semantics = [#tpu.dimension_semantics<parallel>, #tpu.dimension_semantics<arbitrary>], iteration_bounds = array<i64: 2, 8>, scalar_prefetch = 0 : i64, scratch_operands = 1 : i64, tpu.core_type = #tpu.core_type<tc>, window_params = [{transform_indices = @transform_0, window_bounds = array<i64: 1, 1, 16, 104>}, {transform_indices = @transform_1, window_bounds = array<i64: 1, 16, 32>}, {pipeline_mode = #tpu.pipeline_mode<synchronous>, transform_indices = @transform_2, window_bounds = array<i64: 32, 72>}, {pipeline_mode = #tpu.pipeline_mode<synchronous>, transform_indices = @transform_3, window_bounds = array<i64: 32, 32>}, {pipeline_mode = #tpu.pipeline_mode<synchronous>, transform_indices = @transform_4, window_bounds = array<i64: 1, 64>}, {pipeline_mode = #tpu.pipeline_mode<synchronous>, transform_indices = @transform_5, window_bounds = array<i64: 1, 32>}, {transform_indices = @transform_6, window_bounds = array<i64: 1, 1, 16, 32>}]} {
    %c0_i32 = arith.constant 0 : i32
    %0 = arith.cmpi eq, %arg1, %c0_i32 : i32
    %1 = arith.extui %0 : i1 to i32
    %c0_i32_0 = arith.constant 0 : i32
    %2 = arith.cmpi ne, %1, %c0_i32_0 : i32
    scf.if %2 {
      %c0_47 = arith.constant 0 : index
      %c0_48 = arith.constant 0 : index
      %c0_49 = arith.constant 0 : index
      %115 = vector.load %arg3[%c0_47, %c0_48, %c0_49] : memref<1x16x32xf32, #tpu.memory_space<vmem>>, vector<1x16x32xf32>
      %116 = vector.shape_cast %115 : vector<1x16x32xf32> to vector<16x32xf32>
      %c0_50 = arith.constant 0 : index
      %c0_51 = arith.constant 0 : index
      %117 = vector.load %arg9[%c0_50, %c0_51] : memref<16x32xf32, #tpu.memory_space<vmem>>, vector<16x32xf32>
      tpu.vector_store %arg9[%c0_50, %c0_51], %116 {strides = array<i32>} : memref<16x32xf32, #tpu.memory_space<vmem>>, vector<16x32xf32>,
    } else {
    }
    %c0 = arith.constant 0 : index
    %c0_1 = arith.constant 0 : index
    %3 = vector.load %arg9[%c0, %c0_1] : memref<16x32xf32, #tpu.memory_space<vmem>>, vector<16x32xf32>
    %c0_2 = arith.constant 0 : index
    %c0_3 = arith.constant 0 : index
    %4 = vector.load %arg4[%c0_2, %c0_3] : memref<32x72xbf16, #tpu.memory_space<vmem>>, vector<32x72xbf16>
    %5 = arith.truncf %3 : vector<16x32xf32> to vector<16x32xbf16>
    %cst = arith.constant dense<0.000000e+00> : vector<16x72xf32>
    %6 = tpu.matmul %5, %4, %cst {dimension_numbers = #tpu.dot_dimension_numbers<[1], [0], [0], [1], [0, 0, 1, 1], [], []>} : vector<16x32xbf16>, vector<32x72xbf16>, vector<16x72xf32> -> vector<16x72xf32>
    %c0_4 = arith.constant 0 : index
    %c0_5 = arith.constant 0 : index
    %c0_6 = arith.constant 0 : index
    %c0_7 = arith.constant 0 : index
    %7 = vector.load %arg2[%c0_4, %c0_5, %c0_6, %c0_7] : memref<1x1x16x104xbf16, #tpu.memory_space<vmem>>, vector<1x1x16x104xbf16>
    %8 = vector.shape_cast %7 : vector<1x1x16x104xbf16> to vector<16x104xbf16>
    %9 = arith.extf %8 : vector<16x104xbf16> to vector<16x104xf32>
    %10 = vector.extract_strided_slice %9 {offsets = [0, 0], sizes = [16, 8], strides = [1, 1]} : vector<16x104xf32> to vector<16x8xf32>
    %11 = vector.extract_strided_slice %6 {offsets = [0, 0], sizes = [16, 8], strides = [1, 1]} : vector<16x72xf32> to vector<16x8xf32>
    %12 = arith.addf %10, %11 : vector<16x8xf32>
    %13 = vector.extract_strided_slice %9 {offsets = [0, 8], sizes = [16, 64], strides = [1, 1]} : vector<16x104xf32> to vector<16x64xf32>
    %14 = vector.extract_strided_slice %6 {offsets = [0, 8], sizes = [16, 64], strides = [1, 1]} : vector<16x72xf32> to vector<16x64xf32>
    %15 = arith.addf %13, %14 : vector<16x64xf32>
    %16 = vector.extract_strided_slice %9 {offsets = [0, 72], sizes = [16, 32], strides = [1, 1]} : vector<16x104xf32> to vector<16x32xf32>
    %17 = vector.extract_strided_slice %12 {offsets = [0, 0], sizes = [16, 4], strides = [1, 1]} : vector<16x8xf32> to vector<16x4xf32>
    %cst_8 = arith.constant dense<0xFF800000> : vector<16xf32>
    %18 = vector.multi_reduction <maximumf>, %17, %cst_8 [1] : vector<16x4xf32> to vector<16xf32>
    %19 = vector.shape_cast %18 : vector<16xf32> to vector<16x1xf32>
    %20 = vector.broadcast %19 : vector<16x1xf32> to vector<16x4xf32>
    %21 = arith.subf %17, %20 : vector<16x4xf32>
    %22 = math.exp %21 : vector<16x4xf32>
    %cst_9 = arith.constant dense<0.000000e+00> : vector<16xf32>
    %23 = vector.multi_reduction <add>, %22, %cst_9 [1] : vector<16x4xf32> to vector<16xf32>
    %24 = vector.shape_cast %23 : vector<16xf32> to vector<16x1xf32>
    %25 = tpu.reciprocal %24 {approx = true} : vector<16x1xf32> -> vector<16x1xf32>
    %26 = vector.broadcast %25 : vector<16x1xf32> to vector<16x4xf32>
    %27 = arith.mulf %22, %26 : vector<16x4xf32>
    %cst_10 = arith.constant dense<0xFF800000> : vector<16xf32>
    %28 = vector.multi_reduction <maximumf>, %27, %cst_10 [1] : vector<16x4xf32> to vector<16xf32>
    %29 = vector.shape_cast %28 : vector<16xf32> to vector<16x1xf32>
    %30 = vector.broadcast %29 : vector<16x1xf32> to vector<16x4xf32>
    %31 = arith.cmpf oge, %27, %30 : vector<16x4xf32>
    %cst_11 = arith.constant 0xFF800000 : f32
    %32 = vector.broadcast %cst_11 : f32 to vector<16x4xf32>
    %33 = arith.select %31, %32, %27 : vector<16x4xi1>, vector<16x4xf32>
    %cst_12 = arith.constant dense<0xFF800000> : vector<16xf32>
    %34 = vector.multi_reduction <maximumf>, %33, %cst_12 [1] : vector<16x4xf32> to vector<16xf32>
    %35 = vector.shape_cast %34 : vector<16xf32> to vector<16x1xf32>
    %36 = vector.broadcast %35 : vector<16x1xf32> to vector<16x4xf32>
    %37 = arith.cmpf oge, %27, %36 : vector<16x4xf32>
    %cst_13 = arith.constant 0.000000e+00 : f32
    %38 = vector.broadcast %cst_13 : f32 to vector<16x4xf32>
    %39 = arith.select %37, %27, %38 : vector<16x4xi1>, vector<16x4xf32>
    %cst_14 = arith.constant dense<0.000000e+00> : vector<16xf32>
    %40 = vector.multi_reduction <add>, %39, %cst_14 [1] : vector<16x4xf32> to vector<16xf32>
    %41 = vector.shape_cast %40 : vector<16xf32> to vector<16x1xf32>
    %42 = tpu.reciprocal %41 {approx = true} : vector<16x1xf32> -> vector<16x1xf32>
    %43 = vector.broadcast %42 : vector<16x1xf32> to vector<16x4xf32>
    %44 = arith.mulf %39, %43 : vector<16x4xf32>
    %45 = vector.extract_strided_slice %12 {offsets = [0, 4], sizes = [16, 4], strides = [1, 1]} : vector<16x8xf32> to vector<16x4xf32>
    %cst_15 = arith.constant dense<0xFF800000> : vector<16xf32>
    %46 = vector.multi_reduction <maximumf>, %45, %cst_15 [1] : vector<16x4xf32> to vector<16xf32>
    %47 = vector.shape_cast %46 : vector<16xf32> to vector<16x1xf32>
    %48 = vector.broadcast %47 : vector<16x1xf32> to vector<16x4xf32>
    %49 = arith.subf %45, %48 : vector<16x4xf32>
    %50 = math.exp %49 : vector<16x4xf32>
    %cst_16 = arith.constant dense<0.000000e+00> : vector<16xf32>
    %51 = vector.multi_reduction <add>, %50, %cst_16 [1] : vector<16x4xf32> to vector<16xf32>
    %52 = vector.shape_cast %51 : vector<16xf32> to vector<16x1xf32>
    %53 = tpu.reciprocal %52 {approx = true} : vector<16x1xf32> -> vector<16x1xf32>
    %54 = vector.broadcast %53 : vector<16x1xf32> to vector<16x4xf32>
    %55 = arith.mulf %50, %54 : vector<16x4xf32>
    %cst_17 = arith.constant dense<0xFF800000> : vector<16xf32>
    %56 = vector.multi_reduction <maximumf>, %55, %cst_17 [1] : vector<16x4xf32> to vector<16xf32>
    %57 = vector.shape_cast %56 : vector<16xf32> to vector<16x1xf32>
    %58 = vector.broadcast %57 : vector<16x1xf32> to vector<16x4xf32>
    %59 = arith.cmpf oge, %55, %58 : vector<16x4xf32>
    %cst_18 = arith.constant 0xFF800000 : f32
    %60 = vector.broadcast %cst_18 : f32 to vector<16x4xf32>
    %61 = arith.select %59, %60, %55 : vector<16x4xi1>, vector<16x4xf32>
    %cst_19 = arith.constant dense<0xFF800000> : vector<16xf32>
    %62 = vector.multi_reduction <maximumf>, %61, %cst_19 [1] : vector<16x4xf32> to vector<16xf32>
    %63 = vector.shape_cast %62 : vector<16xf32> to vector<16x1xf32>
    %64 = vector.broadcast %63 : vector<16x1xf32> to vector<16x4xf32>
    %65 = arith.cmpf oge, %55, %64 : vector<16x4xf32>
    %cst_20 = arith.constant 0.000000e+00 : f32
    %66 = vector.broadcast %cst_20 : f32 to vector<16x4xf32>
    %67 = arith.select %65, %55, %66 : vector<16x4xi1>, vector<16x4xf32>
    %cst_21 = arith.constant dense<0.000000e+00> : vector<16xf32>
    %68 = vector.multi_reduction <add>, %67, %cst_21 [1] : vector<16x4xf32> to vector<16xf32>
    %69 = vector.shape_cast %68 : vector<16xf32> to vector<16x1xf32>
    %70 = tpu.reciprocal %69 {approx = true} : vector<16x1xf32> -> vector<16x1xf32>
    %71 = vector.broadcast %70 : vector<16x1xf32> to vector<16x4xf32>
    %72 = arith.mulf %67, %71 : vector<16x4xf32>
    %cst_22 = arith.constant dense<0.000000e+00> : vector<4x64xf32>
    %73 = tpu.matmul %44, %15, %cst_22 {dimension_numbers = #tpu.dot_dimension_numbers<[0], [0], [1], [1], [0, 1, 1, 1], [], []>} : vector<16x4xf32>, vector<16x64xf32>, vector<4x64xf32> -> vector<4x64xf32>
    %cst_23 = arith.constant dense<0.000000e+00> : vector<16x64xf32>
    %74 = tpu.matmul %44, %73, %cst_23 {dimension_numbers = #tpu.dot_dimension_numbers<[1], [0], [0], [1], [0, 0, 1, 1], [], []>} : vector<16x4xf32>, vector<4x64xf32>, vector<16x64xf32> -> vector<16x64xf32>
    %cst_24 = arith.constant dense<0.000000e+00> : vector<4x64xf32>
    %75 = tpu.matmul %72, %15, %cst_24 {dimension_numbers = #tpu.dot_dimension_numbers<[0], [0], [1], [1], [0, 1, 1, 1], [], []>} : vector<16x4xf32>, vector<16x64xf32>, vector<4x64xf32> -> vector<4x64xf32>
    %cst_25 = arith.constant dense<0.000000e+00> : vector<16x64xf32>
    %76 = tpu.matmul %72, %75, %cst_25 {dimension_numbers = #tpu.dot_dimension_numbers<[1], [0], [0], [1], [0, 0, 1, 1], [], []>} : vector<16x4xf32>, vector<4x64xf32>, vector<16x64xf32> -> vector<16x64xf32>
    %77 = arith.addf %74, %76 : vector<16x64xf32>
    %cst_26 = arith.constant 5.000000e-01 : f32
    %78 = vector.broadcast %cst_26 : f32 to vector<16x64xf32>
    %79 = arith.mulf %77, %78 : vector<16x64xf32>
    %c0_27 = arith.constant 0 : index
    %c0_28 = arith.constant 0 : index
    %80 = vector.load %arg6[%c0_27, %c0_28] : memref<1x64xf32, #tpu.memory_space<vmem>>, vector<1x64xf32>
    %81 = vector.broadcast %80 : vector<1x64xf32> to vector<16x64xf32>
    %82 = arith.addf %79, %81 : vector<16x64xf32>
    %83 = arith.negf %82 : vector<16x64xf32>
    %84 = math.exp %83 : vector<16x64xf32>
    %cst_29 = arith.constant 1.000000e+00 : f32
    %85 = vector.broadcast %cst_29 : f32 to vector<16x64xf32>
    %86 = arith.addf %85, %84 : vector<16x64xf32>
    %87 = arith.divf %85, %86 : vector<16x64xf32>
    %88 = vector.extract_strided_slice %87 {offsets = [0, 0], sizes = [16, 32], strides = [1, 1]} : vector<16x64xf32> to vector<16x32xf32>
    %89 = vector.extract_strided_slice %87 {offsets = [0, 32], sizes = [16, 32], strides = [1, 1]} : vector<16x64xf32> to vector<16x32xf32>
    %c0_30 = arith.constant 0 : index
    %c0_31 = arith.constant 0 : index
    %90 = vector.load %arg5[%c0_30, %c0_31] : memref<32x32xbf16, #tpu.memory_space<vmem>>, vector<32x32xbf16>
    %91 = arith.mulf %88, %3 : vector<16x32xf32>
    %92 = arith.truncf %91 : vector<16x32xf32> to vector<16x32xbf16>
    %cst_32 = arith.constant dense<0.000000e+00> : vector<16x32xf32>
    %93 = tpu.matmul %92, %90, %cst_32 {dimension_numbers = #tpu.dot_dimension_numbers<[1], [0], [0], [1], [0, 0, 1, 1], [], []>} : vector<16x32xbf16>, vector<32x32xbf16>, vector<16x32xf32> -> vector<16x32xf32>
    %94 = arith.addf %16, %93 : vector<16x32xf32>
    %cst_33 = arith.constant dense<0.000000e+00> : vector<4x32xf32>
    %95 = tpu.matmul %44, %94, %cst_33 {dimension_numbers = #tpu.dot_dimension_numbers<[0], [0], [1], [1], [0, 1, 1, 1], [], []>} : vector<16x4xf32>, vector<16x32xf32>, vector<4x32xf32> -> vector<4x32xf32>
    %cst_34 = arith.constant dense<0.000000e+00> : vector<16x32xf32>
    %96 = tpu.matmul %44, %95, %cst_34 {dimension_numbers = #tpu.dot_dimension_numbers<[1], [0], [0], [1], [0, 0, 1, 1], [], []>} : vector<16x4xf32>, vector<4x32xf32>, vector<16x32xf32> -> vector<16x32xf32>
    %cst_35 = arith.constant dense<0.000000e+00> : vector<4x32xf32>
    %97 = tpu.matmul %72, %94, %cst_35 {dimension_numbers = #tpu.dot_dimension_numbers<[0], [0], [1], [1], [0, 1, 1, 1], [], []>} : vector<16x4xf32>, vector<16x32xf32>, vector<4x32xf32> -> vector<4x32xf32>
    %cst_36 = arith.constant dense<0.000000e+00> : vector<16x32xf32>
    %98 = tpu.matmul %72, %97, %cst_36 {dimension_numbers = #tpu.dot_dimension_numbers<[1], [0], [0], [1], [0, 0, 1, 1], [], []>} : vector<16x4xf32>, vector<4x32xf32>, vector<16x32xf32> -> vector<16x32xf32>
    %99 = arith.addf %96, %98 : vector<16x32xf32>
    %cst_37 = arith.constant 5.000000e-01 : f32
    %100 = vector.broadcast %cst_37 : f32 to vector<16x32xf32>
    %101 = arith.mulf %99, %100 : vector<16x32xf32>
    %c0_38 = arith.constant 0 : index
    %c0_39 = arith.constant 0 : index
    %102 = vector.load %arg7[%c0_38, %c0_39] : memref<1x32xf32, #tpu.memory_space<vmem>>, vector<1x32xf32>
    %103 = vector.broadcast %102 : vector<1x32xf32> to vector<16x32xf32>
    %104 = arith.addf %101, %103 : vector<16x32xf32>
    %105 = math.tanh %104 : vector<16x32xf32>
    %106 = arith.mulf %89, %3 : vector<16x32xf32>
    %cst_40 = arith.constant 1.000000e+00 : f32
    %107 = vector.broadcast %cst_40 : f32 to vector<16x32xf32>
    %108 = arith.subf %107, %89 : vector<16x32xf32>
    %109 = arith.mulf %108, %105 : vector<16x32xf32>
    %110 = arith.addf %106, %109 : vector<16x32xf32>
    %c0_41 = arith.constant 0 : index
    %c0_42 = arith.constant 0 : index
    %111 = vector.load %arg9[%c0_41, %c0_42] : memref<16x32xf32, #tpu.memory_space<vmem>>, vector<16x32xf32>
    tpu.vector_store %arg9[%c0_41, %c0_42], %110 {strides = array<i32>} : memref<16x32xf32, #tpu.memory_space<vmem>>, vector<16x32xf32>,
    %c0_43 = arith.constant 0 : index
    %c0_44 = arith.constant 0 : index
    %c0_45 = arith.constant 0 : index
    %c0_46 = arith.constant 0 : index
    %112 = vector.load %arg8[%c0_43, %c0_44, %c0_45, %c0_46] : memref<1x1x16x32xf32, #tpu.memory_space<vmem>>, vector<1x1x16x32xf32>
    %113 = vector.shape_cast %112 : vector<1x1x16x32xf32> to vector<16x32xf32>
    %114 = vector.shape_cast %110 : vector<16x32xf32> to vector<1x1x16x32xf32>
    tpu.vector_store %arg8[%c0_43, %c0_44, %c0_45, %c0_46], %114 {strides = array<i32>} : memref<1x1x16x32xf32, #tpu.memory_space<vmem>>, vector<1x1x16x32xf32>,
    return
  }
  func.func @transform_0(%arg0: i32, %arg1: i32) -> (i32, i32, i32, i32) {
    %c0_i32 = arith.constant 0 : i32
    %c0_i32_0 = arith.constant 0 : i32
    %c0_i32_1 = arith.constant 0 : i32
    return %arg1, %arg0, %c0_i32, %c0_i32_0 : i32, i32, i32, i32
  }
  func.func @transform_1(%arg0: i32, %arg1: i32) -> (i32, i32, i32) {
    %c0_i32 = arith.constant 0 : i32
    %c0_i32_0 = arith.constant 0 : i32
    %c0_i32_1 = arith.constant 0 : i32
    return %arg0, %c0_i32, %c0_i32_0 : i32, i32, i32
  }
  func.func @transform_2(%arg0: i32, %arg1: i32) -> (i32, i32) {
    %c0_i32 = arith.constant 0 : i32
    %c0_i32_0 = arith.constant 0 : i32
    %c0_i32_1 = arith.constant 0 : i32
    return %c0_i32, %c0_i32_0 : i32, i32
  }
  func.func @transform_3(%arg0: i32, %arg1: i32) -> (i32, i32) {
    %c0_i32 = arith.constant 0 : i32
    %c0_i32_0 = arith.constant 0 : i32
    %c0_i32_1 = arith.constant 0 : i32
    return %c0_i32, %c0_i32_0 : i32, i32
  }
  func.func @transform_4(%arg0: i32, %arg1: i32) -> (i32, i32) {
    %c0_i32 = arith.constant 0 : i32
    %c0_i32_0 = arith.constant 0 : i32
    %c0_i32_1 = arith.constant 0 : i32
    return %c0_i32, %c0_i32_0 : i32, i32
  }
  func.func @transform_5(%arg0: i32, %arg1: i32) -> (i32, i32) {
    %c0_i32 = arith.constant 0 : i32
    %c0_i32_0 = arith.constant 0 : i32
    %c0_i32_1 = arith.constant 0 : i32
    return %c0_i32, %c0_i32_0 : i32, i32
  }
  func.func @transform_6(%arg0: i32, %arg1: i32) -> (i32, i32, i32, i32) {
    %c0_i32 = arith.constant 0 : i32
    %c0_i32_0 = arith.constant 0 : i32
    %c0_i32_1 = arith.constant 0 : i32
    return %arg0, %arg1, %c0_i32, %c0_i32_0 : i32, i32, i32, i32
  }
}

</mosaic_0001>

<bundles_post_ra>
// kernel: agrnn_forward.2
= control target key start
LH: loop header
LB: loop body
LE: loop exit
PB: predicated region body
PF: predicated region fallthrough
CT: control target
= control target key end

     0   :  { %vm174_vm0 = vcmask 1041408   ;;  %vm125_vm1 = vcmask 31744   ;;  %vm467_vm2 = vcmask 846848   ;;  %s881_s1 = inlined_call_operand.vmem [shape: bf16[4,104], index: 1, kind: input, shape index: {}]   ;;  %s882_s0 = inlined_call_operand.vmem [shape: bf16[256,4], index: 0, kind: input, shape index: {}]   ;;  %s883_s2 = inlined_call_operand.vmem [shape: bf16[256,104], index: 2, kind: output, shape index: {}]  }
   0x1   :  { %v44_v0 = vld [vmem:[%s881_s1] sm:$0x3]  ;;  %v657_v4 = vld [vmem:[%s882_s0 + $0x8] sm:$0xff]   ;;  %v659_v6 = vld [vmem:[%s882_s0 + $0x10] sm:$0xff]  }
   0x2   :  { %653 = vmatprep.subr.msk.bf16.mxu0 %vm174_vm0, %v44_v0  ;;  %654 = vmatprep.subr.msk.bf16.mxu1 %vm174_vm0, %v44_v0  ;;  %v176_v1 = vsel %vm174_vm0, %v44_v0, 0  ;;  %v655_v2 = vld [vmem:[%s882_s0] sm:$0xff]   ;;  %v658_v5 = vld [vmem:[%s882_s0 + $0x48] sm:$0xff]   ;;  %v660_v7 = vld [vmem:[%s882_s0 + $0x50] sm:$0xff]  }
   0x3   :  { %618 = vmatpush3.bf16.msra.mxu0 %v176_v1  ;;  %652 = vmatpush3.bf16.msra.mxu1 %v176_v1  ;;  %v656_v3 = vld [vmem:[%s882_s0 + $0x40] sm:$0xff]   ;;  %v661_v8 = vld [vmem:[%s882_s0 + $0x18] sm:$0xff]   ;;  %v665_v12 = vld [vmem:[%s882_s0 + $0x28] sm:$0xff]  }
   0x4   :  { %619 = vmatprep.mubr.msk.bf16.mxu0 %vm125_vm1, %v655_v2  ;;  %635 = vmatprep.mubr.msk.bf16.mxu1 %vm125_vm1, %v656_v3  ;;  %v662_v9 = vld [vmem:[%s882_s0 + $0x58] sm:$0xff]   ;;  %v663_v10 = vld [vmem:[%s882_s0 + $0x20] sm:$0xff]   ;;  %v666_v13 = vld [vmem:[%s882_s0 + $0x68] sm:$0xff]  }
   0x5   :  { %v664_v11 = vld [vmem:[%s882_s0 + $0x60] sm:$0xff]   ;;  %v667_v14 = vld [vmem:[%s882_s0 + $0x30] sm:$0xff]   ;;  %v669_v16 = vld [vmem:[%s882_s0 + $0x38] sm:$0xff]  }
   0x6   :  { %620 = vmatmul.mubr.msk.bf16.vlgmr.msra.gmra.mxu0 %vm125_vm1, %v657_v4  ;;  %636 = vmatmul.mubr.msk.bf16.vlgmr.msra.gmra.mxu1 %vm125_vm1, %v658_v5  ;;  %v668_v15 = vld [vmem:[%s882_s0 + $0x70] sm:$0xff]   ;;  %v670_v17 = vld [vmem:[%s882_s0 + $0x78] sm:$0xff]  }
   0x7   :  { %623 = vmatprep.mubr.msk.bf16.mxu0 %vm125_vm1, %v659_v6  ;;  %639 = vmatprep.mubr.msk.bf16.mxu1 %vm125_vm1, %v660_v7 }
   0xe   :  { %624 = vmatmul.mubr.msk.bf16.gmra.mxu0 %vm125_vm1, %v661_v8  ;;  %640 = vmatmul.mubr.msk.bf16.gmra.mxu1 %vm125_vm1, %v662_v9 }
   0xf   :  { %627 = vmatprep.mubr.msk.bf16.mxu0 %vm125_vm1, %v663_v10  ;;  %643 = vmatprep.mubr.msk.bf16.mxu1 %vm125_vm1, %v664_v11 }
  0x16   :  { %628 = vmatmul.mubr.msk.bf16.gmra.mxu0 %vm125_vm1, %v665_v12  ;;  %644 = vmatmul.mubr.msk.bf16.gmra.mxu1 %vm125_vm1, %v666_v13 }
  0x17   :  { %631 = vmatprep.mubr.msk.bf16.mxu0 %vm125_vm1, %v667_v14  ;;  %647 = vmatprep.mubr.msk.bf16.mxu1 %vm125_vm1, %v668_v15 }
  0x1e   :  { %632 = vmatmul.mubr.msk.bf16.gmra.mxu0 %vm125_vm1, %v669_v16  ;;  %648 = vmatmul.mubr.msk.bf16.gmra.mxu1 %vm125_vm1, %v670_v17 }
  0xc6   :  { %v621_v18 = vpop.f32.mrf.mxu0  ;;  %v637_v20 = vpop.f32.mrf.mxu1 }
  0xc7   :  { %v570_v19 = vpack.c.bf16 %v621_v18, %v621_v18  ;;  %v586_v21 = vpack.c.bf16 %v637_v20, %v637_v20 }
  0xc8   :  { %v212_v22 = vpop.f32.mrf.mxu0  ;;  %v276_v24 = vpop.f32.mrf.mxu1 }
  0xc9   :  { %470 = vst.msk [vmem:[%s883_s2 + $0x8] sm:$0xf] %vm467_vm2, %v570_v19  ;;  %v568_v23 = vpack.c.bf16 %v212_v22, %v212_v22  ;;  %486 = vst.msk [vmem:[%s883_s2 + $0x48] sm:$0xf] %vm467_vm2, %v586_v21  ;;  %v584_v25 = vpack.c.bf16 %v276_v24, %v276_v24 }
  0xca   :  { %v622_v26 = vpop.f32.mrf.mxu0  ;;  %v638_v28 = vpop.f32.mrf.mxu1 }
  0xcb   :  { %468 = vst.msk [vmem:[%s883_s2] sm:$0xf] %vm467_vm2, %v568_v23  ;;  %v571_v27 = vpack.c.bf16 %v622_v26, %v622_v26  ;;  %484 = vst.msk [vmem:[%s883_s2 + $0x40] sm:$0xf] %vm467_vm2, %v584_v25  ;;  %v587_v29 = vpack.c.bf16 %v638_v28, %v638_v28 }
  0xcc   :  { %v215_v30 = vpop.f32.mrf.mxu0  ;;  %v279_v32 = vpop.f32.mrf.mxu1 }
  0xcd   :  { %471 = vst.msk [vmem:[%s883_s2 + $0xc] sm:$0xf] %vm467_vm2, %v571_v27  ;;  %v569_v31 = vpack.c.bf16 %v215_v30, %v215_v30  ;;  %487 = vst.msk [vmem:[%s883_s2 + $0x4c] sm:$0xf] %vm467_vm2, %v587_v29  ;;  %v585_v33 = vpack.c.bf16 %v279_v32, %v279_v32 }
  0xce   :  { %v625_v34 = vpop.f32.mrf.mxu0  ;;  %v641_v36 = vpop.f32.mrf.mxu1 }
  0xcf   :  { %469 = vst.msk [vmem:[%s883_s2 + $0x4] sm:$0xf] %vm467_vm2, %v569_v31  ;;  %v574_v35 = vpack.c.bf16 %v625_v34, %v625_v34  ;;  %485 = vst.msk [vmem:[%s883_s2 + $0x44] sm:$0xf] %vm467_vm2, %v585_v33  ;;  %v590_v37 = vpack.c.bf16 %v641_v36, %v641_v36 }
  0xd0   :  { %v228_v38 = vpop.f32.mrf.mxu0  ;;  %v292_v40 = vpop.f32.mrf.mxu1 }
  0xd1   :  { %474 = vst.msk [vmem:[%s883_s2 + $0x18] sm:$0xf] %vm467_vm2, %v574_v35  ;;  %v572_v39 = vpack.c.bf16 %v228_v38, %v228_v38  ;;  %490 = vst.msk [vmem:[%s883_s2 + $0x58] sm:$0xf] %vm467_vm2, %v590_v37  ;;  %v588_v41 = vpack.c.bf16 %v292_v40, %v292_v40 }
  0xd2   :  { %v626_v42 = vpop.f32.mrf.mxu0  ;;  %v642_v44 = vpop.f32.mrf.mxu1 }
  0xd3   :  { %472 = vst.msk [vmem:[%s883_s2 + $0x10] sm:$0xf] %vm467_vm2, %v572_v39  ;;  %v575_v43 = vpack.c.bf16 %v626_v42, %v626_v42  ;;  %488 = vst.msk [vmem:[%s883_s2 + $0x50] sm:$0xf] %vm467_vm2, %v588_v41  ;;  %v591_v45 = vpack.c.bf16 %v642_v44, %v642_v44 }
  0xd4   :  { %v231_v46 = vpop.f32.mrf.mxu0  ;;  %v295_v48 = vpop.f32.mrf.mxu1 }
  0xd5   :  { %475 = vst.msk [vmem:[%s883_s2 + $0x1c] sm:$0xf] %vm467_vm2, %v575_v43  ;;  %v573_v47 = vpack.c.bf16 %v231_v46, %v231_v46  ;;  %491 = vst.msk [vmem:[%s883_s2 + $0x5c] sm:$0xf] %vm467_vm2, %v591_v45  ;;  %v589_v49 = vpack.c.bf16 %v295_v48, %v295_v48 }
  0xd6   :  { %v629_v50 = vpop.f32.mrf.mxu0  ;;  %v645_v52 = vpop.f32.mrf.mxu1 }
  0xd7   :  { %473 = vst.msk [vmem:[%s883_s2 + $0x14] sm:$0xf] %vm467_vm2, %v573_v47  ;;  %v578_v51 = vpack.c.bf16 %v629_v50, %v629_v50  ;;  %489 = vst.msk [vmem:[%s883_s2 + $0x54] sm:$0xf] %vm467_vm2, %v589_v49  ;;  %v594_v53 = vpack.c.bf16 %v645_v52, %v645_v52 }
  0xd8   :  { %v244_v54 = vpop.f32.mrf.mxu0  ;;  %v308_v56 = vpop.f32.mrf.mxu1 }
  0xd9   :  { %478 = vst.msk [vmem:[%s883_s2 + $0x28] sm:$0xf] %vm467_vm2, %v578_v51  ;;  %v576_v55 = vpack.c.bf16 %v244_v54, %v244_v54  ;;  %494 = vst.msk [vmem:[%s883_s2 + $0x68] sm:$0xf] %vm467_vm2, %v594_v53  ;;  %v592_v57 = vpack.c.bf16 %v308_v56, %v308_v56 }
  0xda   :  { %v630_v58 = vpop.f32.mrf.mxu0  ;;  %v646_v60 = vpop.f32.mrf.mxu1 }
  0xdb   :  { %476 = vst.msk [vmem:[%s883_s2 + $0x20] sm:$0xf] %vm467_vm2, %v576_v55  ;;  %v579_v59 = vpack.c.bf16 %v630_v58, %v630_v58  ;;  %492 = vst.msk [vmem:[%s883_s2 + $0x60] sm:$0xf] %vm467_vm2, %v592_v57  ;;  %v595_v61 = vpack.c.bf16 %v646_v60, %v646_v60 }
  0xdc   :  { %v247_v62 = vpop.f32.mrf.mxu0  ;;  %v311_v0 = vpop.f32.mrf.mxu1 }
  0xdd   :  { %479 = vst.msk [vmem:[%s883_s2 + $0x2c] sm:$0xf] %vm467_vm2, %v579_v59  ;;  %v577_v63 = vpack.c.bf16 %v247_v62, %v247_v62  ;;  %495 = vst.msk [vmem:[%s883_s2 + $0x6c] sm:$0xf] %vm467_vm2, %v595_v61  ;;  %v593_v1 = vpack.c.bf16 %v311_v0, %v311_v0 }
  0xde   :  { %v633_v2 = vpop.f32.mrf.mxu0  ;;  %v649_v4 = vpop.f32.mrf.mxu1 }
  0xdf   :  { %477 = vst.msk [vmem:[%s883_s2 + $0x24] sm:$0xf] %vm467_vm2, %v577_v63  ;;  %v582_v3 = vpack.c.bf16 %v633_v2, %v633_v2  ;;  %493 = vst.msk [vmem:[%s883_s2 + $0x64] sm:$0xf] %vm467_vm2, %v593_v1  ;;  %v598_v5 = vpack.c.bf16 %v649_v4, %v649_v4 }
  0xe0   :  { %v260_v6 = vpop.f32.mrf.mxu0  ;;  %v324_v8 = vpop.f32.mrf.mxu1 }
  0xe1   :  { %482 = vst.msk [vmem:[%s883_s2 + $0x38] sm:$0xf] %vm467_vm2, %v582_v3  ;;  %v580_v7 = vpack.c.bf16 %v260_v6, %v260_v6  ;;  %498 = vst.msk [vmem:[%s883_s2 + $0x78] sm:$0xf] %vm467_vm2, %v598_v5  ;;  %v596_v9 = vpack.c.bf16 %v324_v8, %v324_v8 }
  0xe2   :  { %v634_v10 = vpop.f32.mrf.mxu0  ;;  %v650_v12 = vpop.f32.mrf.mxu1 }
  0xe3   :  { %480 = vst.msk [vmem:[%s883_s2 + $0x30] sm:$0xf] %vm467_vm2, %v580_v7  ;;  %v583_v11 = vpack.c.bf16 %v634_v10, %v634_v10  ;;  %496 = vst.msk [vmem:[%s883_s2 + $0x70] sm:$0xf] %vm467_vm2, %v596_v9  ;;  %v599_v13 = vpack.c.bf16 %v650_v12, %v650_v12 }
  0xe4   :  { %v263_v14 = vpop.f32.mrf.mxu0  ;;  %v327_v16 = vpop.f32.mrf.mxu1 }
  0xe5   :  { %483 = vst.msk [vmem:[%s883_s2 + $0x3c] sm:$0xf] %vm467_vm2, %v583_v11  ;;  %v581_v15 = vpack.c.bf16 %v263_v14, %v263_v14  ;;  %499 = vst.msk [vmem:[%s883_s2 + $0x7c] sm:$0xf] %vm467_vm2, %v599_v13  ;;  %v597_v17 = vpack.c.bf16 %v327_v16, %v327_v16 }
  0xe7   :  { %481 = vst.msk [vmem:[%s883_s2 + $0x34] sm:$0xf] %vm467_vm2, %v581_v15  ;;  %497 = vst.msk [vmem:[%s883_s2 + $0x74] sm:$0xf] %vm467_vm2, %v597_v17 }

// kernel: agrnn_forward.3
= control target key start
LH: loop header
LB: loop body
LE: loop exit
PB: predicated region body
PF: predicated region fallthrough
CT: control target
= control target key end

     0   :  { %s1772_s21 = smov 0   ;;  %s1774_s22 = smov 0   ;;  %s2007_s0 = inlined_call_operand.vmem [shape: bf16[8,2,16,104], index: 0, kind: input, shape index: {}]   ;;  %s2008_s1 = inlined_call_operand.vmem [shape: f32[2,16,32], index: 1, kind: input, shape index: {}]   ;;  %s2009_s2 = inlined_call_operand.vmem [shape: bf16[32,72], index: 2, kind: input, shape index: {}]   ;;  %s2010_s3 = inlined_call_operand.vmem [shape: bf16[32,32], index: 3, kind: input, shape index: {}]   ;;  %s2011_s4 = inlined_call_operand.vmem [shape: f32[1,64], index: 4, kind: input, shape index: {}]   ;;  %s2012_s5 = inlined_call_operand.vmem [shape: f32[1,32], index: 5, kind: input, shape index: {}]   ;;  %s2013_s6 = inlined_call_operand.vmem [shape: f32[2,8,16,32], index: 6, kind: output, shape index: {}]  }
   0x1   :  { %s1776_s23 = smov 0   ;;  %s1778_s24 = smov 0  }
   0x2   :  { %s1780_s25 = smov 0  }
   0x3 LB: > { %s25_s26 = sadd.s32 1, %s1719_s23  ;;  %s28_s27 = sadd.s32 1, %s1723_s24  ;;  %s1727_s25 = sphi %s1780_s25, %s16_s25   ;;  %s1723_s24 = sphi %s1778_s24, %s2019_s24   ;;  %s1719_s23 = sphi %s1776_s23, %s2018_s23   ;;  %s1715_s22 = sphi %s1774_s22, %s2017_s22   ;;  %s1711_s21 = sphi %s1772_s21, %s2016_s21  }
   0x4   : > { %p26_p0 = scmp.ge.s32.totalorder %s25_s26, 8  ;;  %p1464_p1 = scmp.ge.s32.totalorder %s1727_s25, 1 }
   0x5   : > { %p242_p2 = scmp.lt.s32.totalorder %s1727_s25, 17 }
   0x6   : > { %s2021_s26 = smov (%p26_p0, %s25_s26), 0  ;;  %s2023_s27 = smov (!%p26_p0, %s28_s27), %s1723_s24 }
   0x7   : > { %p243_p3 = pnand %p1464_p1, %p242_p2  ;;  %p30_p4 = scmp.ge.s32.totalorder %s2023_s27, 2 }
   0x8   : > { %p285_p5 = scmp.lt.s32.totalorder (!%p243_p3), %s1711_s21, 7  ;;  %p287_p6 = scmp.lt.s32.totalorder (!%p243_p3), %s1715_s22, 1 }
   0x9   : > { %s2025_s27 = smov (%p30_p4, %s2023_s27), 0  ;;  %246 = sbr.rel (%p243_p3) target bundleno = 2964 (0xb94), region = 44 }
   0xa   : > { %2014 = sst [smem:[#allocation3_spill]] %s2025_s27  ;;  %p1473_p7 = scmp.ne.s32.totalorder (!%p243_p3), %s1711_s21, 0 }
   0xe   : > { %s286_s28 = scalar_select %p285_p5, %s1711_s21, 7 }
   0xf   : > { %s2027_s22 = smov (!%p287_p6, %s1715_s22), 1 }
  0x10   : > { %s1466_s29 = sshll.u32 %s286_s28, 2  ;;  %s1470_s30 = sshll.u32 %s286_s28, 1 }
  0x11   : > { %s1465_s7 = sshll.u32 %s2027_s22, 1  ;;  %s1502_s8 = sshll.u32 %s2027_s22, 4 }
  0x12   : > { %s291_s9 = sadd.s32 %s1466_s29, %s1465_s7  ;;  %s298_s12 = scalar_lea.vmem %s2008_s1, %s1502_s8 }
  0x13   : > { %s1467_s13 = sshll.u32 %s291_s9, 2  ;;  %s305_s14 = sadd.s32 %s1502_s8, %s1470_s30 }
  0x14   : > { %s293_s17 = scalar_lea.vmem %s2007_s0, %s1467_s13  ;;  %s1472_s18 = sshll.u32 %s305_s14, 3 }
  0x15   : > { %s1815_s27 = scalar_lea.vmem %s2013_s6, %s1472_s18  ;;  %312 = sbr.rel (%p1473_p7) target bundleno = 28 (0x1c), region = 48 }
  0x1a   : > { %v313_v0 = vld [vmem:[%s298_s12] sm:$0xff]  ;;  %vm315_vm0 = vcmask 261120   ;;  %v314_v1 = vld [vmem:[%s298_s12 + $0x8] sm:$0xff] }
  0x1b   : > { %316 = vst.msk [vmem:[#allocation2] sm:$0xff] %vm315_vm0, %v313_v0  ;;  %317 = vst.msk [vmem:[#allocation2 + $0x8] sm:$0xff] %vm315_vm0, %v314_v1 }
  0x1c PF: > { %v1649_v2 = vld [vmem:[%s2009_s2 + $0x8] sm:$0xff]   ;;  %v1729_v3 = vmov 0.0   ;;  %v1650_v4 = vld [vmem:[%s2009_s2] sm:$0xff]   ;;  %vm1730_vm1 = vmmov 0   ;;  %vm337_vm2 = vcmask 261120   ;;  %vm441_vm3 = vcmask 64544  }
  0x1d   : > { %1537 = vmatprep.subr.bf16.mxu0 %v1729_v3  ;;  %1545 = vmatprep.subr.mxu1 %v1729_v3  ;;  %v1838_v8 = vld [vmem:[%s293_s17] sm:$0xff]   ;;  %s1731_s21 = smov 124   ;;  %vm388_vm4 = vcmask 31744   ;;  %s1732_s7 = smov 120   ;;  %vm550_vm13 = vcmask 130048   ;;  %vm741_vm14 = vcmask 1043456  }
  0x1e   : > { %1538 = vmatpush3.bf16.msra.mxu0 %v1649_v2  ;;  %1541 = vmatprep.mubr.msk.bf16.mxu0 %vm1730_vm1, %v1729_v3  ;;  %v1505_v9 = vunpack.c.l.bf16 %v1838_v8  ;;  %v1506_v12 = vunpack.c.h.bf16 %v1838_v8  ;;  %s1733_s14 = smov 72   ;;  %s1734_s15 = smov 56  }
  0x1f   : > { %1539 = vmatprep.subr.bf16.mxu0 %v1729_v3  ;;  %1549 = vmatprep.mubr.msk.f32.mxu1 %vm1730_vm1, %v1729_v3  ;;  %s1735_s16 = smov 32   ;;  %s1736_s19 = smov 96  }
  0x22   : > { %v1828_v5 = vld [vmem:[#allocation2] sm:$0xff]  ;;  %v1830_v6 = vld [vmem:[#allocation2 + $0x8] sm:$0xff]  ;;  %1540 = vmatpush3.bf16.msra.mxu0 %v1650_v4 }
  0x23   : > { %v324_v7 = vpack.c.bf16 %v1830_v6, %v1828_v5 }
  0x25   : > { %1542 = vmatmul.mubr.msk.bf16.vlgmr.msra.gmra.mxu0 %vm337_vm2, %v324_v7 }
  0xe5   : > { %v375_v10 = vpop.f32.mrf.mxu0 }
  0xe6   : > { %v1843_v11 = vadd.f32 %v1505_v9, %v375_v10 }
  0xe7   : > { %v1543_v13 = vpop.f32.mrf.mxu0 }
  0xe8   : > { %v442_v14 = vsel %vm441_vm3, %v1843_v11, -inf  ;;  %v389_v30 = vsel %vm388_vm4, %v1843_v11, -inf }
  0xe9   : > { %443 = vmax.xlane.f32.xlu0 %v442_v14  ;;  %v378_v15 = vpop.f32.mrf.mxu0 }
  0xea   : > { %v1850_v16 = vadd.f32 %v1506_v12, %v378_v15 }
  0xeb   : > { %v1544_v17 = vpop.f32.mrf.mxu0 }
  0xec   : > { %v445_v18 = vsel %vm441_vm3, %v1850_v16, -inf  ;;  %v392_v32 = vsel %vm388_vm4, %v1850_v16, -inf }
  0xed   : > { %446 = vmax.xlane.f32.xlu0 %v445_v18 }
 0x172   : > { %v444_v19 = vpop.xlane.xlu0 %443 }
 0x173   : > { %v448_v20 = vsub.f32 %v1843_v11, %v444_v19 }
 0x175   : > { %v450_v21 = vmul.f32 1.442695, %v448_v20 }
 0x176   : > { %v447_v22 = vpop.xlane.xlu0 %446 }
 0x177   : > { %1653 = vpow2.f32 %v450_v21  ;;  %v449_v23 = vsub.f32 %v1850_v16, %v447_v22 }
 0x179   : > { %v452_v24 = vmul.f32 1.442695, %v449_v23 }
 0x17b   : > { %1655 = vpow2.f32 %v452_v24 }
 0x184   : > { %v1654_v25 = vpop.eup %1653 }
 0x185   : > { %456 = vrot.lane.b32.xlu1 %v1654_v25, %s1731_s21 }
 0x188   : > { %v1656_v26 = vpop.eup %1655 }
 0x189   : > { %458 = vrot.lane.b32.xlu1 %v1656_v26, %s1731_s21 }
 0x1f7   : > { %v457_v27 = vpop.permute.xlu1 %456 }
 0x1f8   : > { %v462_v28 = vsel %vm388_vm4, %v457_v27, 0.0 }
 0x1f9   : > { %463 = vadd.xlane.f32.xlu0 %v462_v28 }
 0x1fb   : > { %v459_v29 = vpop.permute.xlu1 %458 }
 0x1fc   : > { %v465_v31 = vsel %vm388_vm4, %v459_v29, 0.0 }
 0x1fd   : > { %390 = vmax.xlane.f32.xlu0 %v389_v30  ;;  %466 = vadd.xlane.f32.xlu1 %v465_v31 }
 0x201   : > { %393 = vmax.xlane.f32.xlu0 %v392_v32 }
 0x282   : > { %v464_v33 = vpop.xlane.xlu0 %463 }
 0x283   : > { %1657 = vrcp.f32 %v464_v33 }
 0x286   : > { %v467_v34 = vpop.xlane.xlu1 %466  ;;  %v391_v35 = vpop.xlane.xlu0 %390 }
 0x287   : > { %1659 = vrcp.f32 %v467_v34  ;;  %v395_v36 = vsub.f32 %v1843_v11, %v391_v35 }
 0x289   : > { %v397_v37 = vmul.f32 1.442695, %v395_v36 }
 0x28a   : > { %v394_v38 = vpop.xlane.xlu0 %393 }
 0x28b   : > { %1661 = vpow2.f32 %v397_v37  ;;  %v396_v39 = vsub.f32 %v1850_v16, %v394_v38 }
 0x28d   : > { %v399_v40 = vmul.f32 1.442695, %v396_v39 }
 0x28f   : > { %1663 = vpow2.f32 %v399_v40 }
 0x290   : > { %v1658_v41 = vpop.eup %1657 }
 0x291   : > { %v470_v42 = vmul.f32 %v1658_v41, %v1654_v25 }
 0x293   : > { %v472_v43 = vsel %vm441_vm3, %v470_v42, -inf }
 0x294   : > { %v1660_v44 = vpop.eup %1659  ;;  %473 = vmax.xlane.f32.xlu0 %v472_v43 }
 0x295   : > { %v471_v45 = vmul.f32 %v1660_v44, %v1656_v26 }
 0x297   : > { %v475_v46 = vsel %vm441_vm3, %v471_v45, -inf }
 0x298   : > { %v1662_v47 = vpop.eup %1661  ;;  %476 = vmax.xlane.f32.xlu0 %v475_v46 }
 0x299   : > { %v401_v48 = vsel %vm388_vm4, %v1662_v47, 0.0 }
 0x29c   : > { %v1664_v49 = vpop.eup %1663  ;;  %402 = vadd.xlane.f32.xlu0 %v401_v48 }
 0x29d   : > { %v404_v50 = vsel %vm388_vm4, %v1664_v49, 0.0 }
 0x2a0   : > { %405 = vadd.xlane.f32.xlu0 %v404_v50  ;;  %v1652_v50 = vld [vmem:[%s2010_s3] sm:$0xff]  }
 0x31d   : > { %v474_v51 = vpop.xlane.xlu0 %473 }
 0x31e   : > { %vm478_vm5 = vcmp.ge.f32.partialorder %v470_v42, %v474_v51 }
 0x31f   : > { %v480_v52 = vsel %vm478_vm5, -inf, %v470_v42 }
 0x320   : > { %v482_v53 = vsel %vm441_vm3, %v480_v52, -inf }
 0x321   : > { %483 = vmax.xlane.f32.xlu0 %v482_v53  ;;  %v477_v54 = vpop.xlane.xlu0 %476 }
 0x322   : > { %vm479_vm6 = vcmp.ge.f32.partialorder %v471_v45, %v477_v54 }
 0x323   : > { %v481_v55 = vsel %vm479_vm6, -inf, %v471_v45 }
 0x324   : > { %v485_v56 = vsel %vm441_vm3, %v481_v55, -inf  ;;  %v1485_v55 = vld [vmem:[%s2011_s4] ss:$0 sm:$0xff] }
 0x325   : > { %486 = vmax.xlane.f32.xlu0 %v485_v56  ;;  %v403_v57 = vpop.xlane.xlu0 %402 }
 0x326   : > { %1665 = vrcp.f32 %v403_v57 }
 0x329   : > { %v406_v58 = vpop.xlane.xlu0 %405 }
 0x32a   : > { %1667 = vrcp.f32 %v406_v58 }
 0x333   : > { %v1666_v59 = vpop.eup %1665 }
 0x334   : > { %v409_v60 = vmul.f32 %v1666_v59, %v1662_v47 }
 0x336   : > { %v411_v61 = vsel %vm388_vm4, %v409_v60, -inf }
 0x337   : > { %v1668_v62 = vpop.eup %1667  ;;  %412 = vmax.xlane.f32.xlu0 %v411_v61 }
 0x338   : > { %v410_v63 = vmul.f32 %v1668_v62, %v1664_v49  ;;  %v1651_v49 = vld [vmem:[%s2010_s3 + $0x8] sm:$0xff]  }
 0x33a   : > { %v414_v0 = vsel %vm388_vm4, %v410_v63, -inf }
 0x33b   : > { %415 = vmax.xlane.f32.xlu1 %v414_v0 }
 0x3aa   : > { %v484_v1 = vpop.xlane.xlu0 %483 }
 0x3ab   : > { %vm488_vm7 = vcmp.ge.f32.partialorder %v470_v42, %v484_v1 }
 0x3ac   : > { %v490_v2 = vsel %vm488_vm7, %v470_v42, 0.0 }
 0x3ad   : > { %494 = vrot.lane.b32.xlu0 %v490_v2, %s1731_s21 }
 0x3ae   : > { %v487_v4 = vpop.xlane.xlu0 %486 }
 0x3af   : > { %vm489_vm8 = vcmp.ge.f32.partialorder %v471_v45, %v487_v4 }
 0x3b0   : > { %v491_v7 = vsel %vm489_vm8, %v471_v45, 0.0 }
 0x3b1   : > { %496 = vrot.lane.b32.xlu1 %v491_v7, %s1731_s21 }
 0x3c0   : > { %v413_v14 = vpop.xlane.xlu0 %412 }
 0x3c1   : > { %vm417_vm10 = vcmp.ge.f32.partialorder %v409_v60, %v413_v14 }
 0x3c2   : > { %v419_v17 = vsel %vm417_vm10, -inf, %v409_v60 }
 0x3c3   : > { %v421_v18 = vsel %vm388_vm4, %v419_v17, -inf }
 0x3c4   : > { %v416_v10 = vpop.xlane.xlu1 %415 }
 0x3c5   : > { %vm418_vm9 = vcmp.ge.f32.partialorder %v410_v63, %v416_v10 }
 0x3c6   : > { %v420_v13 = vsel %vm418_vm9, -inf, %v410_v63 }
 0x3c7   : > { %v424_v15 = vsel %vm388_vm4, %v420_v13, -inf }
 0x3cc   : > { %425 = vmax.xlane.f32.xlu0 %v424_v15 }
 0x3d5   : > { %422 = vmax.xlane.f32.xlu1 %v421_v18 }
 0x41f   : > { %v495_v19 = vpop.permute.xlu0 %494 }
 0x420   : > { %v500_v20 = vsel %vm388_vm4, %v495_v19, 0.0 }
 0x421   : > { %501 = vadd.xlane.f32.xlu0 %v500_v20 }
 0x423   : > { %v497_v21 = vpop.permute.xlu1 %496 }
 0x424   : > { %v503_v22 = vsel %vm388_vm4, %v497_v21, 0.0 }
 0x425   : > { %504 = vadd.xlane.f32.xlu1 %v503_v22 }
 0x455   : > { %v426_v23 = vpop.xlane.xlu0 %425 }
 0x456   : > { %vm428_vm11 = vcmp.ge.f32.partialorder %v410_v63, %v426_v23 }
 0x457   : > { %v430_v24 = vsel %vm428_vm11, %v410_v63, 0.0 }
 0x458   : > { %v434_v25 = vsel %vm388_vm4, %v430_v24, 0.0 }
 0x459   : > { %435 = vadd.xlane.f32.xlu1 %v434_v25 }
 0x45e   : > { %v423_v26 = vpop.xlane.xlu1 %422 }
 0x45f   : > { %vm427_vm12 = vcmp.ge.f32.partialorder %v409_v60, %v423_v26 }
 0x460   : > { %v429_v27 = vsel %vm427_vm12, %v409_v60, 0.0 }
 0x461   : > { %v431_v28 = vsel %vm388_vm4, %v429_v27, 0.0 }
 0x462   : > { %432 = vadd.xlane.f32.xlu0 %v431_v28 }
 0x4aa   : > { %v502_v29 = vpop.xlane.xlu0 %501 }
 0x4ab   : > { %1669 = vrcp.f32 %v502_v29  ;;  %v1499_v29 = vld [vmem:[%s2012_s5] ss:$0 sm:$0xff] }
 0x4ae   : > { %v505_v30 = vpop.xlane.xlu1 %504 }
 0x4af   : > { %1671 = vrcp.f32 %v505_v30 }
 0x4b8   : > { %v1670_v31 = vpop.eup %1669 }
 0x4b9   : > { %v508_v32 = vmul.f32 %v1670_v31, %v490_v2 }
 0x4bb   : > { %626 = vrot.lane.b32.xlu0 %v508_v32, %s1731_s21 }
 0x4bc   : > { %v1672_v33 = vpop.eup %1671 }
 0x4bd   : > { %v509_v34 = vmul.f32 %v1672_v33, %v491_v7 }
 0x4bf   : > { %628 = vrot.lane.b32.xlu1 %v509_v34, %s1731_s21 }
 0x4c3   : > { %546 = vrot.lane.b32.xlu1 %v1850_v16, %s1732_s7 }
 0x4c7   : > { %544 = vrot.lane.b32.xlu1 %v1843_v11, %s1732_s7 }
 0x4e2   : > { %v436_v35 = vpop.xlane.xlu1 %435 }
 0x4eb   : > { %v433_v36 = vpop.xlane.xlu0 %432 }
 0x4ec   : > { %1673 = vrcp.f32 %v433_v36 }
 0x4ed   : > { %1675 = vrcp.f32 %v436_v35 }
 0x4f9   : > { %v1674_v37 = vpop.eup %1673 }
 0x4fa   : > { %v1886_v38 = vmul.f32 %v1674_v37, %v429_v27  ;;  %v1676_v39 = vpop.eup %1675 }
 0x4fb   : > { %v1891_v40 = vmul.f32 %v1676_v39, %v430_v24 }
 0x4fc   : > { %510 = vxpose.xlu0.b32.start [1/2] (short) (narrow) %v1886_v38, 8  ;;  %1566 = vmatprep.mubr.msk.f32.mxu0 %vm388_vm4, %v1886_v38 }
 0x500   : > { %511 = vxpose.xlu0.b32.end [2/2] (short) (narrow) %v1891_v40, 8 }
 0x52d   : > { %v1894_v16 = vpop.permute.xlu0 %626 }
 0x52e   : > { %632 = vxpose.xlu1.b32.start [1/2] (short) (narrow) %v1894_v16, 8 }
 0x531   : > { %v1897_v11 = vpop.permute.xlu1 %628 }
 0x532   : > { %633 = vxpose.xlu1.b32.end [2/2] (short) (narrow) %v1897_v11, 8 }
 0x535   : > { %v547_v41 = vpop.permute.xlu1 %546 }
 0x536   : > { %1546 = vmatpush3.msra.mxu1 %v547_v41 }
 0x537   : > { %1547 = vmatprep.subr.mxu1 %v1729_v3 }
 0x539   : > { %v545_v42 = vpop.permute.xlu1 %544 }
 0x53a   : > { %1548 = vmatpush3.msra.mxu1 %v545_v42 }
 0x53b   : > { %1552 = vmatprep.subr.mxu1 %v1729_v3 }
 0x578   : > { %v1902_v43 = vpop.trf.xlu0 }
 0x579   : > { %1550 = vmatmul.mubr.msk.f32.vlgmr.msra.gmra.mxu1 %vm550_vm13, %v1902_v43 }
 0x57a   : > { %1553 = vmatpush3.msra.mxu1 %v547_v41  ;;  %1556 = vmatprep.mubr.msk.f32.mxu1 %vm1730_vm1, %v1729_v3 }
 0x57b   : > { %1554 = vmatprep.subr.mxu1 %v1729_v3 }
 0x57c   : > { %1555 = vmatpush3.msra.mxu1 %v545_v42 }
 0x5aa   : > { %v1909_v44 = vpop.trf.xlu1 }
 0x5ab   : > { %1557 = vmatmul.mubr.msk.f32.vlgmr.msra.gmra.mxu1 %vm550_vm13, %v1909_v44 }
 0x5ac   : > { %1561 = vmatprep.mubr.msk.f32.mxu1 %vm388_vm4, %v1894_v16 }
 0x639   : > { %v620_v45 = vpop.f32.mrf.mxu1 }
 0x63a   : > { %1564 = vmatprep.subr.msk.mxu0 %vm741_vm14, %v620_v45 }
 0x63b   : > { %1565 = vmatpush3.msk.msra.mxu0 %vm741_vm14, %v620_v45  ;;  %v1551_v46 = vpop.f32.mrf.mxu1 }
 0x63c   : > { %1567 = vmatmul.mubr.msk.f32.vlgmr.msra.gmra.mxu0 %vm388_vm4, %v1891_v40  ;;  %1577 = vmatprep.subr.mxu0 %v1729_v3 }
 0x63d   : > { %1581 = vmatprep.mubr.msk.f32.mxu0 %vm1730_vm1, %v1729_v3 }
 0x66b   : > { %v733_v47 = vpop.f32.mrf.mxu1 }
 0x66c   : > { %1559 = vmatprep.subr.msk.mxu1 %vm741_vm14, %v733_v47 }
 0x66d   : > { %v1558_v48 = vpop.f32.mrf.mxu1  ;;  %1560 = vmatpush3.msk.msra.mxu1 %vm741_vm14, %v733_v47 }
 0x66e   : > { %1562 = vmatmul.mubr.msk.f32.vlgmr.msra.gmra.mxu1 %vm388_vm4, %v1897_v11  ;;  %1569 = vmatprep.subr.bf16.mxu1 %v1729_v3 }
 0x66f   : > { %1573 = vmatprep.mubr.msk.bf16.mxu1 %vm1730_vm1, %v1729_v3  ;;  %1570 = vmatpush3.bf16.msra.mxu1 %v1651_v49 }
 0x670   : > { %1571 = vmatprep.subr.bf16.mxu1 %v1729_v3 }
 0x673   : > { %1572 = vmatpush3.bf16.msra.mxu1 %v1652_v50 }
 0x6fc   : > { %v1568_v51 = vpop.f32.mrf.mxu0 }
 0x6fe   : > { %v895_v54 = vpop.f32.mrf.mxu0 }
 0x72e   : > { %v1563_v52 = vpop.f32.mrf.mxu1 }
 0x72f   : > { %v901_v53 = vadd.f32 %v1568_v51, %v1563_v52 }
 0x730   : > { %v811_v56 = vpop.f32.mrf.mxu1 }
 0x731   : > { %v905_v57 = vmul.f32 0.5, %v901_v53  ;;  %v896_v58 = vadd.f32 %v895_v54, %v811_v56 }
 0x733   : > { %v914_v59 = vadd.f32 %v1485_v55, %v905_v57  ;;  %v904_v60 = vmul.f32 0.5, %v896_v58 }
 0x735   : > { %v1487_v61 = vmul.f32 -1.442695, %v914_v59  ;;  %v913_v62 = vadd.f32 %v1485_v55, %v904_v60 }
 0x737   : > { %1677 = vpow2.f32 %v1487_v61  ;;  %v1486_v63 = vmul.f32 -1.442695, %v913_v62 }
 0x739   : > { %1679 = vpow2.f32 %v1486_v63 }
 0x744   : > { %v1678_v0 = vpop.eup %1677 }
 0x745   : > { %v922_v1 = vadd.f32 1.0, %v1678_v0 }
 0x746   : > { %v1680_v2 = vpop.eup %1679 }
 0x747   : > { %1681 = vrcp.f32 %v922_v1  ;;  %v921_v4 = vadd.f32 1.0, %v1680_v2 }
 0x749   : > { %1683 = vrcp.f32 %v921_v4 }
 0x754   : > { %v1939_v7 = vpop.eup %1681 }
 0x755   : > { %v932_v14 = vmul.f32 %v1939_v7, %v1830_v6 }
 0x756   : > { %v1941_v10 = vpop.eup %1683 }
 0x757   : > { %v931_v13 = vmul.f32 %v1941_v10, %v1828_v5  ;;  %v1327_v42 = vsub.f32 1.0, %v1941_v10 }
 0x759   : > { %v933_v15 = vpack.c.bf16 %v932_v14, %v931_v13 }
 0x75b   : > { %1574 = vmatmul.mubr.msk.bf16.vlgmr.msra.gmra.mxu1 %vm337_vm2, %v933_v15 }
 0x75c   : > { %1598 = vmatprep.mubr.msk.f32.mxu1 %vm388_vm4, %v1886_v38 }
 0x81b   : > { %v983_v17 = vpop.f32.mrf.mxu1 }
 0x81c   : > { %992 = vrot.lane.b32.xlu1 %v983_v17, %s1733_s14 }
 0x81d   : > { %v1575_v18 = vpop.f32.mrf.mxu1 }
 0x81f   : > { %v986_v19 = vpop.f32.mrf.mxu1 }
 0x820   : > { %994 = vrot.lane.b32.xlu0 %v986_v19, %s1733_s14 }
 0x821   : > { %v1576_v20 = vpop.f32.mrf.mxu1 }
 0x88e   : > { %v993_v21 = vpop.permute.xlu1 %992 }
 0x88f   : > { %v998_v22 = vadd.f32 %v1505_v9, %v993_v21 }
 0x891   : > { %1002 = vrot.lane.b32.xlu1 %v998_v22, %s1734_s15 }
 0x892   : > { %v995_v23 = vpop.permute.xlu0 %994 }
 0x893   : > { %v999_v24 = vadd.f32 %v1506_v12, %v995_v23 }
 0x895   : > { %1321 = vrot.lane.b32.xlu1 %v1830_v6, %s1735_s16  ;;  %1004 = vrot.lane.b32.xlu0 %v999_v24, %s1734_s15 }
 0x899   : > { %1319 = vrot.lane.b32.xlu0 %v1828_v5, %s1735_s16 }
 0x903   : > { %v1003_v26 = vpop.permute.xlu1 %1002 }
 0x907   : > { %v1005_v25 = vpop.permute.xlu0 %1004  ;;  %v1322_v38 = vpop.permute.xlu1 %1321 }
 0x908   : > { %1578 = vmatpush3.msra.mxu0 %v1005_v25 }
 0x909   : > { %1579 = vmatprep.subr.mxu0 %v1729_v3 }
 0x90a   : > { %1580 = vmatpush3.msra.mxu0 %v1003_v26 }
 0x90b   : > { %1582 = vmatmul.mubr.msk.f32.vlgmr.msra.gmra.mxu0 %vm550_vm13, %v1902_v43  ;;  %1584 = vmatprep.subr.mxu0 %v1729_v3  ;;  %v1320_v39 = vpop.permute.xlu0 %1319 }
 0x90c   : > { %1585 = vmatpush3.msra.mxu0 %v1005_v25  ;;  %1588 = vmatprep.mubr.msk.f32.mxu0 %vm1730_vm1, %v1729_v3 }
 0x90d   : > { %1586 = vmatprep.subr.mxu0 %v1729_v3 }
 0x90e   : > { %1587 = vmatpush3.msra.mxu0 %v1003_v26 }
 0x90f   : > { %1589 = vmatmul.mubr.msk.f32.vlgmr.msra.gmra.mxu0 %vm550_vm13, %v1909_v44  ;;  %v1325_v44 = vmul.f32 %v1941_v10, %v1320_v39 }
 0x910   : > { %1593 = vmatprep.mubr.msk.f32.mxu0 %vm388_vm4, %v1894_v16 }
 0x9cb   : > { %v1074_v5 = vpop.f32.mrf.mxu0 }
 0x9cc   : > { %1596 = vmatprep.subr.msk.mxu1 %vm741_vm14, %v1074_v5 }
 0x9cd   : > { %v1583_v6 = vpop.f32.mrf.mxu0  ;;  %1597 = vmatpush3.msk.msra.mxu1 %vm741_vm14, %v1074_v5 }
 0x9ce   : > { %1599 = vmatmul.mubr.msk.f32.vlgmr.msra.gmra.mxu1 %vm388_vm4, %v1891_v40  ;;  %v1328_v40 = vsub.f32 1.0, %v1939_v7 }
 0x9cf   : > { %v1144_v8 = vpop.f32.mrf.mxu0 }
 0x9d0   : > { %1591 = vmatprep.subr.msk.mxu0 %vm741_vm14, %v1144_v8 }
 0x9d1   : > { %v1590_v3 = vpop.f32.mrf.mxu0  ;;  %1592 = vmatpush3.msk.msra.mxu0 %vm741_vm14, %v1144_v8 }
 0x9d2   : > { %1594 = vmatmul.mubr.msk.f32.vlgmr.msra.gmra.mxu0 %vm388_vm4, %v1897_v11  ;;  %v1326_v11 = vmul.f32 %v1939_v7, %v1322_v38 }
 0xa8e   : > { %v1600_v9 = vpop.f32.mrf.mxu1 }
 0xa90   : > { %v1295_v28 = vpop.f32.mrf.mxu1 }
 0xa92   : > { %v1595_v12 = vpop.f32.mrf.mxu0 }
 0xa93   : > { %v1301_v27 = vadd.f32 %v1600_v9, %v1595_v12 }
 0xa94   : > { %v1217_v30 = vpop.f32.mrf.mxu0 }
 0xa95   : > { %v1305_v31 = vmul.f32 0.5, %v1301_v27  ;;  %v1296_v32 = vadd.f32 %v1295_v28, %v1217_v30 }
 0xa97   : > { %v1314_v33 = vadd.f32 %v1499_v29, %v1305_v31  ;;  %v1304_v34 = vmul.f32 0.5, %v1296_v32 }
 0xa99   : > { %1685 = vtanh.f32 %v1314_v33  ;;  %v1313_v35 = vadd.f32 %v1499_v29, %v1304_v34 }
 0xa9b   : > { %1687 = vtanh.f32 %v1313_v35 }
 0xaa6   : > { %v1686_v36 = vpop.eup %1685 }
 0xaa7   : > { %1333 = vrot.lane.b32.xlu1 %v1686_v36, %s1735_s16 }
 0xaa8   : > { %v1688_v37 = vpop.eup %1687 }
 0xaa9   : > { %1331 = vrot.lane.b32.xlu0 %v1688_v37, %s1735_s16 }
 0xb19   : > { %v1334_v16 = vpop.permute.xlu1 %1333 }
 0xb1a   : > { %v1338_v41 = vmul.f32 %v1334_v16, %v1328_v40 }
 0xb1b   : > { %v1332_v43 = vpop.permute.xlu0 %1331 }
 0xb1c   : > { %v1340_v45 = vadd.f32 %v1338_v41, %v1326_v11  ;;  %v1337_v46 = vmul.f32 %v1332_v43, %v1327_v42 }
 0xb1e   : > { %v1339_v47 = vadd.f32 %v1337_v46, %v1325_v44  ;;  %1345 = vrot.lane.b32.xlu1 %v1340_v45, %s1736_s19 }
 0xb20   : > { %1343 = vrot.lane.b32.xlu0 %v1339_v47, %s1736_s19 }
 0xb90   : > { %v1346_v48 = vpop.permute.xlu1 %1345 }
 0xb91   : > { %1350 = vst.msk [vmem:[#allocation2 + $0x8] sm:$0xff] %vm337_vm2, %v1346_v48  ;;  %1352 = vst.msk [vmem:[%s1815_s27 + $0x8] sm:$0xff] %vm337_vm2, %v1346_v48 }
 0xb92   : > { %v1344_v49 = vpop.permute.xlu0 %1343 }
 0xb93   : > { %1349 = vst.msk [vmem:[#allocation2] sm:$0xff] %vm337_vm2, %v1344_v49  ;;  %1351 = vst.msk [vmem:[%s1815_s27] sm:$0xff] %vm337_vm2, %v1344_v49 }
 0xb94 PF: > { %s16_s25 = sadd.s32 1, %s1727_s25   ;;  %s2015_s20 = sld [smem:[#allocation3_spill]] }
 0xb95   : > { %p13_p8 = scmp.ge.s32.totalorder %s16_s25, 18   ;;  %s2016_s21 = smov %s1719_s23 }
 0xb96   : > { %s2017_s22 = smov %s1723_s24  ;;  %s2018_s23 = smov %s2021_s26 }
 0xb97   :  { %15 = sbr.rel (!%p13_p8) target bundleno = 3 (0x3), region = 81 }
 0xb9a   : > { %s2019_s24 = smov %s2015_s20 }

</bundles_post_ra>
